<compile_context>
chip_gen: v7x
topology: tpu7x:2x2x1
jax: 0.10.0
libtpu: 0.0.40
codegen_flags: <defaults>
</compile_context>

<pallas_src>
import jax
import jax.numpy as jnp
from jax.experimental import pallas as pl
from jax.experimental.pallas import tpu as pltpu

N_STATE = 8     # n_state  (input features)
N_ACTION = 4    # n_action (output features / Q-values)
HIDDEN = (20, 30, 18)
N_LAYERS = 4
LANE = 128      # lane-padded feature width for weights / hidden activations


def _round_up(n, m):
    return ((n + m - 1) // m) * m


def _cdiv(a, b):
    return -(-a // b)


def _mlp_kernel(x_ref, w_ref, b_ref, out_ref):
    """One batch tile through the 4-layer MLP.

    x_ref:   (tb, 8)         unpadded input features
    w_ref:   (4, 128, 128)   zero-padded weights, layer-stacked, (in, out)
    b_ref:   (8, 128)        zero-padded biases, row l = layer-l bias
    out_ref: (tb, 4)         Q-values
    """
    # Layer 1: (tb, 8) @ (8, 128) -- only the real 8 input rows of W are read.
    h = (jnp.dot(x_ref[...], w_ref[0, :N_STATE, :],
                 preferred_element_type=jnp.float32)
         + b_ref[0:1, :])
    h = jnp.maximum(h, 0.0)

    # Layers 2..3: full 128x128 (padded lanes stay exactly 0 through
    # zero-weight columns, zero-bias lanes and ReLU).
    for l in range(1, N_LAYERS - 1):
        h = (jnp.dot(h, w_ref[l], preferred_element_type=jnp.float32)
             + b_ref[l:l + 1, :])
        h = jnp.maximum(h, 0.0)

    # Layer 4: Linear, no activation -> q_values; store only the 4 valid lanes.
    q = (jnp.dot(h, w_ref[N_LAYERS - 1], preferred_element_type=jnp.float32)
         + b_ref[N_LAYERS - 1:N_LAYERS, :])
    out_ref[...] = q[:, :N_ACTION].astype(out_ref.dtype)


def pack_params(params):
    """Zero-pad every layer to (128, 128)/(128,) and stack them.

    Call this ONCE when the parameters change (e.g. after a target-net sync),
    not per forward pass.  Padding MUST be zeros so the extra lanes stay
    exactly 0 through bias-add/ReLU and never contaminate later layers."""
    w_stack = jnp.zeros((N_LAYERS, LANE, LANE), dtype=jnp.float32)
    b_stack = jnp.zeros((8, LANE), dtype=jnp.float32)   # 8 rows: sublane aligned
    for l, (w, b) in enumerate(params):
        din, dout = w.shape
        w_stack = w_stack.at[l, :din, :dout].set(w.astype(jnp.float32))
        b_stack = b_stack.at[l, :dout].set(b.astype(jnp.float32))
    return w_stack, b_stack


def net_forward(x, w_stack, b_stack, *, tile_b=512):
    """Run the whole 4-layer MLP in one Pallas call, tiled over batch.

    x:       (batch, N_STATE) float array
    w_stack: (4, 128, 128) packed weights (from pack_params)
    b_stack: (8, 128)      packed biases  (from pack_params)
    """
    batch = x.shape[0]

    # Tile selection: minimize padding, keep tb a multiple of 8, and prefer an
    # even number of tiles when multi-tile so v7x's two TCs stay balanced.
    num_tiles = max(1, _cdiv(batch, tile_b))
    if num_tiles > 1 and num_tiles % 2 == 1:
        num_tiles += 1
    tb = _round_up(_cdiv(batch, num_tiles), 8)
    padded_batch = tb * num_tiles

    x = x.astype(jnp.float32)
    if padded_batch != batch:
        x = jnp.pad(x, ((0, padded_batch - batch), (0, 0)))

    out = pl.pallas_call(
        _mlp_kernel,
        out_shape=jax.ShapeDtypeStruct((padded_batch, N_ACTION), jnp.float32),
        grid_spec=pltpu.PrefetchScalarGridSpec(
            num_scalar_prefetch=0,
            grid=(num_tiles,),
            in_specs=[
                # x: tiled over batch; last block dim (8) == full array dim.
                pl.BlockSpec((tb, N_STATE), lambda i: (i, 0)),
                # weights: constant index_map -> DMA'd once, VMEM-resident.
                pl.BlockSpec((N_LAYERS, LANE, LANE), lambda i: (0, 0, 0)),
                # biases: constant index_map -> VMEM-resident.
                pl.BlockSpec((8, LANE), lambda i: (0, 0)),
            ],
            # Narrow output: last block dim (4) == full array dim.
            out_specs=pl.BlockSpec((tb, N_ACTION), lambda i: (i, 0)),
        ),
        compiler_params=pltpu.CompilerParams(
            # Batch tiles are independent -> shard across v7x's 2 TensorCores
            # (measured no-op on single-TC v5e/v6e).
            dimension_semantics=("parallel",),
        ),
    )(x, w_stack, b_stack)

    return out[:batch] if padded_batch != batch else out


def init_params(key):
    """Deterministic init matching the module's shapes.
    PyTorch: weight ~ N(0, 0.1), weight shape (out, in); we store (in, out)."""
    dims = (N_STATE,) + HIDDEN + (N_ACTION,)
    params = []
    for i in range(len(dims) - 1):
        key, kw, kb = jax.random.split(key, 3)
        w = 0.1 * jax.random.normal(kw, (dims[i], dims[i + 1]), dtype=jnp.float32)
        b = 0.1 * jax.random.normal(kb, (dims[i + 1],), dtype=jnp.float32)
        params.append((w, b))
    return params


def net_forward_ref(x, params):
    h = x
    for i, (w, b) in enumerate(params):
        h = h @ w + b
        if i < len(params) - 1:
            h = jnp.maximum(h, 0.0)
    return h


if __name__ == "__main__":
    key = jax.random.PRNGKey(0)
    key, kx, kx2 = jax.random.split(key, 3)
    params = init_params(key)

    # Pack once (hoisted out of the per-forward path).
    w_stack, b_stack = pack_params(params)
    jax.block_until_ready((w_stack, b_stack))

    # Small shape consistent with the module (single-tile path).
    batch = 2
    x = jax.random.normal(kx, (batch, N_STATE), dtype=jnp.float32)
    q = net_forward(x, w_stack, b_stack)
    jax.block_until_ready(q)
    q_ref = net_forward_ref(x, params)
    assert q.shape == (batch, N_ACTION)
    assert jnp.allclose(q, q_ref, atol=1e-5, rtol=1e-5), "mismatch vs reference (batch=2)"

    # Larger ragged batch: exercises the multi-tile (even-length grid) path.
    batch2 = 300
    x2 = jax.random.normal(kx2, (batch2, N_STATE), dtype=jnp.float32)
    q2 = net_forward(x2, w_stack, b_stack, tile_b=128)
    jax.block_until_ready(q2)
    q2_ref = net_forward_ref(x2, params)
    assert q2.shape == (batch2, N_ACTION)
    assert jnp.allclose(q2, q2_ref, atol=1e-5, rtol=1e-5), "mismatch vs reference (batch=300)"

    print("KERNEL_OK")
</pallas_src>

<mosaic_0001>
module attributes {stable_mosaic.version = 11 : i64} {
  func.func @_mlp_kernel(%arg0: i32, %arg1: memref<8x8xf32, #tpu.memory_space<vmem>>, %arg2: memref<4x128x128xf32, #tpu.memory_space<vmem>>, %arg3: memref<8x128xf32, #tpu.memory_space<vmem>>, %arg4: memref<8x4xf32, #tpu.memory_space<vmem>>) attributes {dimension_semantics = [#tpu.dimension_semantics<parallel>], iteration_bounds = array<i64: 1>, scalar_prefetch = 0 : i64, scratch_operands = 0 : i64, tpu.core_type = #tpu.core_type<tc>, window_params = [{transform_indices = @transform_0, window_bounds = array<i64: 8, 8>}, {pipeline_mode = #tpu.pipeline_mode<synchronous>, transform_indices = @transform_1, window_bounds = array<i64: 4, 128, 128>}, {pipeline_mode = #tpu.pipeline_mode<synchronous>, transform_indices = @transform_2, window_bounds = array<i64: 8, 128>}, {transform_indices = @transform_3, window_bounds = array<i64: 8, 4>}]} {
    %c0 = arith.constant 0 : index
    %c0_0 = arith.constant 0 : index
    %0 = vector.load %arg1[%c0, %c0_0] : memref<8x8xf32, #tpu.memory_space<vmem>>, vector<8x8xf32>
    %c0_1 = arith.constant 0 : index
    %c0_2 = arith.constant 0 : index
    %c0_3 = arith.constant 0 : index
    %1 = vector.load %arg2[%c0_1, %c0_2, %c0_3] : memref<4x128x128xf32, #tpu.memory_space<vmem>>, vector<1x8x128xf32>
    %2 = vector.shape_cast %1 : vector<1x8x128xf32> to vector<8x128xf32>
    %cst = arith.constant dense<0.000000e+00> : vector<8x128xf32>
    %3 = tpu.matmul %0, %2, %cst {dimension_numbers = #tpu.dot_dimension_numbers<[1], [0], [0], [1], [0, 0, 1, 1], [], []>} : vector<8x8xf32>, vector<8x128xf32>, vector<8x128xf32> -> vector<8x128xf32>
    %c0_4 = arith.constant 0 : index
    %c0_5 = arith.constant 0 : index
    %4 = vector.load %arg3[%c0_4, %c0_5] : memref<8x128xf32, #tpu.memory_space<vmem>>, vector<1x128xf32>
    %5 = vector.broadcast %4 : vector<1x128xf32> to vector<8x128xf32>
    %6 = arith.addf %3, %5 : vector<8x128xf32>
    %cst_6 = arith.constant 0.000000e+00 : f32
    %7 = vector.broadcast %cst_6 : f32 to vector<8x128xf32>
    %8 = arith.maximumf %6, %7 : vector<8x128xf32>
    %c1 = arith.constant 1 : index
    %c0_7 = arith.constant 0 : index
    %c0_8 = arith.constant 0 : index
    %9 = vector.load %arg2[%c1, %c0_7, %c0_8] : memref<4x128x128xf32, #tpu.memory_space<vmem>>, vector<1x128x128xf32>
    %10 = vector.shape_cast %9 : vector<1x128x128xf32> to vector<128x128xf32>
    %cst_9 = arith.constant dense<0.000000e+00> : vector<8x128xf32>
    %11 = tpu.matmul %8, %10, %cst_9 {dimension_numbers = #tpu.dot_dimension_numbers<[1], [0], [0], [1], [0, 0, 1, 1], [], []>} : vector<8x128xf32>, vector<128x128xf32>, vector<8x128xf32> -> vector<8x128xf32>
    %c1_10 = arith.constant 1 : index
    %c0_11 = arith.constant 0 : index
    %12 = vector.load %arg3[%c1_10, %c0_11] : memref<8x128xf32, #tpu.memory_space<vmem>>, vector<1x128xf32>
    %13 = vector.broadcast %12 : vector<1x128xf32> to vector<8x128xf32>
    %14 = arith.addf %11, %13 : vector<8x128xf32>
    %cst_12 = arith.constant 0.000000e+00 : f32
    %15 = vector.broadcast %cst_12 : f32 to vector<8x128xf32>
    %16 = arith.maximumf %14, %15 : vector<8x128xf32>
    %c2 = arith.constant 2 : index
    %c0_13 = arith.constant 0 : index
    %c0_14 = arith.constant 0 : index
    %17 = vector.load %arg2[%c2, %c0_13, %c0_14] : memref<4x128x128xf32, #tpu.memory_space<vmem>>, vector<1x128x128xf32>
    %18 = vector.shape_cast %17 : vector<1x128x128xf32> to vector<128x128xf32>
    %cst_15 = arith.constant dense<0.000000e+00> : vector<8x128xf32>
    %19 = tpu.matmul %16, %18, %cst_15 {dimension_numbers = #tpu.dot_dimension_numbers<[1], [0], [0], [1], [0, 0, 1, 1], [], []>} : vector<8x128xf32>, vector<128x128xf32>, vector<8x128xf32> -> vector<8x128xf32>
    %c2_16 = arith.constant 2 : index
    %c0_17 = arith.constant 0 : index
    %20 = vector.load %arg3[%c2_16, %c0_17] : memref<8x128xf32, #tpu.memory_space<vmem>>, vector<1x128xf32>
    %21 = vector.broadcast %20 : vector<1x128xf32> to vector<8x128xf32>
    %22 = arith.addf %19, %21 : vector<8x128xf32>
    %cst_18 = arith.constant 0.000000e+00 : f32
    %23 = vector.broadcast %cst_18 : f32 to vector<8x128xf32>
    %24 = arith.maximumf %22, %23 : vector<8x128xf32>
    %c3 = arith.constant 3 : index
    %c0_19 = arith.constant 0 : index
    %c0_20 = arith.constant 0 : index
    %25 = vector.load %arg2[%c3, %c0_19, %c0_20] : memref<4x128x128xf32, #tpu.memory_space<vmem>>, vector<1x128x128xf32>
    %26 = vector.shape_cast %25 : vector<1x128x128xf32> to vector<128x128xf32>
    %cst_21 = arith.constant dense<0.000000e+00> : vector<8x128xf32>
    %27 = tpu.matmul %24, %26, %cst_21 {dimension_numbers = #tpu.dot_dimension_numbers<[1], [0], [0], [1], [0, 0, 1, 1], [], []>} : vector<8x128xf32>, vector<128x128xf32>, vector<8x128xf32> -> vector<8x128xf32>
    %c3_22 = arith.constant 3 : index
    %c0_23 = arith.constant 0 : index
    %28 = vector.load %arg3[%c3_22, %c0_23] : memref<8x128xf32, #tpu.memory_space<vmem>>, vector<1x128xf32>
    %29 = vector.broadcast %28 : vector<1x128xf32> to vector<8x128xf32>
    %30 = arith.addf %27, %29 : vector<8x128xf32>
    %31 = vector.extract_strided_slice %30 {offsets = [0, 0], sizes = [8, 4], strides = [1, 1]} : vector<8x128xf32> to vector<8x4xf32>
    %c0_24 = arith.constant 0 : index
    %c0_25 = arith.constant 0 : index
    %32 = vector.load %arg4[%c0_24, %c0_25] : memref<8x4xf32, #tpu.memory_space<vmem>>, vector<8x4xf32>
    tpu.vector_store %arg4[%c0_24, %c0_25], %31 {strides = array<i32>} : memref<8x4xf32, #tpu.memory_space<vmem>>, vector<8x4xf32>,
    return
  }
  func.func @transform_0(%arg0: i32) -> (i32, i32) {
    %c0_i32 = arith.constant 0 : i32
    %c0_i32_0 = arith.constant 0 : i32
    return %arg0, %c0_i32 : i32, i32
  }
  func.func @transform_1(%arg0: i32) -> (i32, i32, i32) {
    %c0_i32 = arith.constant 0 : i32
    %c0_i32_0 = arith.constant 0 : i32
    %c0_i32_1 = arith.constant 0 : i32
    %c0_i32_2 = arith.constant 0 : i32
    return %c0_i32, %c0_i32_0, %c0_i32_1 : i32, i32, i32
  }
  func.func @transform_2(%arg0: i32) -> (i32, i32) {
    %c0_i32 = arith.constant 0 : i32
    %c0_i32_0 = arith.constant 0 : i32
    %c0_i32_1 = arith.constant 0 : i32
    return %c0_i32, %c0_i32_0 : i32, i32
  }
  func.func @transform_3(%arg0: i32) -> (i32, i32) {
    %c0_i32 = arith.constant 0 : i32
    %c0_i32_0 = arith.constant 0 : i32
    return %arg0, %c0_i32 : i32, i32
  }
}

</mosaic_0001>

<bundles_post_ra>
// kernel: tpu_custom_call.1
= control target key start
LH: loop header
LB: loop body
LE: loop exit
PB: predicated region body
PF: predicated region fallthrough
CT: control target
= control target key end

     0   :  { %8 = vsyncpa [#allocation3], 0  ;;  %s837_s0 = inlined_call_operand.hbm [shape: f32[8,8], index: 0, kind: input, shape index: {}]   ;;  %s838_s1 = inlined_call_operand.hbm [shape: f32[4,128,128], index: 1, kind: input, shape index: {}]   ;;  %s839_s2 = inlined_call_operand.hbm [shape: f32[8,128], index: 2, kind: input, shape index: {}]   ;;  %s840_s3 = inlined_call_operand.vmem [shape: f32[8,4], index: 3, kind: output, shape index: {}]  }
   0x1   :  { %9 = vsyncpa [#allocation5], 0  ;;  %s737_s12 = smov [#allocation4]   ;;  %s667_s16 = scalar_lea.hbm %s838_s1, 8192 }
   0x2   :  { %s25_s13 = sshll.u32 %s737_s12, 4  ;;  %p668_p0 = scmp.ne.s32.totalorder %s838_s1, %s667_s16  ;;  %s26_s13 = int_to_ptr.vmem [resolvable:$true] %s25_s13 }
   0x3   :  { %p671_p1 = scmp.lt.u32.totalorder %s667_s16, %s838_s1 }
   0x5   :  { %p673_p2 = pnand %p671_p1, %p668_p0 }
   0x7   :  { %676 = shalt.err (!%p673_p2)
}
   0x8   :  { %s677_s21 = scalar_lea.vmem %s26_s13, 8192  ;;  %p682_p4 = scmp.lt.s32.totalorder %s26_s13, %s26_s13 }
   0x9   :  { %p678_p3 = scmp.ne.s32.totalorder %s26_s13, %s677_s21  ;;  %p683_p5 = scmp.lt.s32.totalorder %s677_s21, %s677_s21 }
   0xb   :  { %p684_p6 = por %p683_p5, %p682_p4 }
   0xd   :  { %p685_p7 = pnand %p684_p6, %p678_p3 }
   0xf   :  { %688 = shalt.err (!%p685_p7)
}
  0x10   :  { %s738_s22 = smov 128   ;;  %s739_s23 = smov 8  }
  0x11   :  { %31 = dma.hbm_to_vmem [thread:$0]  %s838_s1, 8192, %s26_s13, [#allocation5], %s738_s22, %s738_s22, %s739_s23  }
  0x12   :  { %s740_s26 = smov [#allocation2]   ;;  %s741_s28 = smov [#allocation6]  }
  0x13   :  { %s16_s27 = sshll.u32 %s740_s26, 4  ;;  %s38_s29 = sshll.u32 %s741_s28, 4  ;;  %s17_s27 = int_to_ptr.vmem [resolvable:$true] %s16_s27  ;;  %s39_s29 = int_to_ptr.vmem [resolvable:$true] %s38_s29 }
  0x14   :  { %s689_s5 = scalar_lea.hbm %s837_s0, 128 }
  0x15   :  { %p690_p8 = scmp.ne.s32.totalorder %s837_s0, %s689_s5  ;;  %p693_p9 = scmp.lt.u32.totalorder %s689_s5, %s837_s0 }
  0x17   :  { %p695_p10 = pnand %p693_p9, %p690_p8 }
  0x19   :  { %698 = shalt.err (!%p695_p10)
}
  0x1a   :  { %s699_s1 = scalar_lea.vmem %s17_s27, 128  ;;  %p704_p12 = scmp.lt.s32.totalorder %s17_s27, %s17_s27 }
  0x1b   :  { %p700_p11 = scmp.ne.s32.totalorder %s17_s27, %s699_s1  ;;  %p705_p13 = scmp.lt.s32.totalorder %s699_s1, %s699_s1 }
  0x1d   :  { %p706_p0 = por %p705_p13, %p704_p12 }
  0x1f   :  { %p707_p1 = pnand %p706_p0, %p700_p11 }
  0x21   :  { %710 = shalt.err (!%p707_p1)
}
  0x22   :  { %19 = dma.hbm_to_vmem [thread:$0]  %s837_s0, 128, %s17_s27, [#allocation3]  }
  0x23   :  { %s711_s14 = scalar_lea.hbm %s839_s2, 128 }
  0x24   :  { %p712_p2 = scmp.ne.s32.totalorder %s839_s2, %s711_s14  ;;  %p715_p3 = scmp.lt.u32.totalorder %s711_s14, %s839_s2 }
  0x26   :  { %p717_p4 = pnand %p715_p3, %p712_p2 }
  0x28   :  { %720 = shalt.err (!%p717_p4)
}
  0x29   :  { %s721_s19 = scalar_lea.vmem %s39_s29, 128  ;;  %p726_p6 = scmp.lt.s32.totalorder %s39_s29, %s39_s29 }
  0x2a   :  { %p722_p5 = scmp.ne.s32.totalorder %s39_s29, %s721_s19  ;;  %p727_p7 = scmp.lt.s32.totalorder %s721_s19, %s721_s19 }
  0x2c   :  { %p728_p8 = por %p727_p7, %p726_p6 }
  0x2e   :  { %p729_p9 = pnand %p728_p8, %p722_p5 }
  0x30   :  { %732 = shalt.err (!%p729_p9)
}
  0x31   :  { %41 = dma.hbm_to_vmem [thread:$0]  %s839_s2, 128, %s39_s29, [#allocation5]  }
  0x32   :  { %733 = dma.done.wait [#allocation3], 128  }
  0x33   :  { %734 = vsyncadd [#allocation3], 4294967168 }
  0x34   :  { %735 = dma.done.wait [#allocation5], 8320  }
  0x35   :  { %736 = vsyncadd [#allocation5], 4294958976  ;;  %v742_v0 = vmov 0.0   ;;  %vm743_vm0 = vmmov 0   ;;  %v744_v1 = vmov 0.0|0.0   ;;  %vm58_vm1 = vcmask 64512  }
  0x36   :  { %477 = vmatprep.subr.mxu0 %v742_v0  ;;  %479 = vmatprep.mubr.msk.f32.mxu0 %vm743_vm0, %v742_v0  ;;  %v52_v2 = vld [vmem:[#allocation4] sm:$0xff]  ;;  %v51_v3 = vld [vmem:[#allocation2] sm:$0xff]  ;;  %v135_v5 = vld [vmem:[#allocation4 + $0x88] sm:$0xff]  ;;  %vm411_vm2 = vcmask 31744  }
  0x37   :  { %587 = vmatprep.subr.bf16.mxu1 %v744_v1  ;;  %514 = vmatprep.mubr.msk.f32.mxu1 %vm743_vm0, %v742_v0  ;;  %v134_v4 = vld [vmem:[#allocation4 + $0x80] sm:$0xff]  ;;  %v136_v6 = vld [vmem:[#allocation4 + $0x90] sm:$0xff]  ;;  %v137_v7 = vld [vmem:[#allocation4 + $0x98] sm:$0xff] }
  0x38   :  { %478 = vmatpush3.msra.mxu0 %v52_v2  ;;  %v588_v8 = vpack.c.bf16 %v135_v5, %v134_v4  ;;  %v591_v9 = vpack.c.bf16 %v137_v7, %v136_v6  ;;  %v138_v10 = vld [vmem:[#allocation4 + $0xa0] sm:$0xff]  ;;  %v139_v11 = vld [vmem:[#allocation4 + $0xa8] sm:$0xff]  ;;  %v140_v13 = vld [vmem:[#allocation4 + $0xb0] sm:$0xff] }
  0x39   :  { %480 = vmatmul.mubr.msk.f32.vlgmr.msra.gmra.mrb[0].mxu0 %vm58_vm1, %v51_v3  ;;  %611 = vmatprep.subr.bf16.mxu0 %v744_v1  ;;  %v594_v12 = vpack.c.bf16 %v139_v11, %v138_v10  ;;  %v141_v14 = vld [vmem:[#allocation4 + $0xb8] sm:$0xff]  ;;  %v142_v16 = vld [vmem:[#allocation4 + $0xc0] sm:$0xff]  ;;  %v143_v17 = vld [vmem:[#allocation4 + $0xc8] sm:$0xff] }
  0x3a   :  { %549 = vmatprep.mubr.msk.f32.mxu0 %vm743_vm0, %v742_v0  ;;  %589 = vmatpush3.bf16.msra.mxu1 %v588_v8  ;;  %v597_v15 = vpack.c.bf16 %v141_v14, %v140_v13  ;;  %v600_v18 = vpack.c.bf16 %v143_v17, %v142_v16  ;;  %v144_v19 = vld [vmem:[#allocation4 + $0xd0] sm:$0xff]  ;;  %v145_v20 = vld [vmem:[#allocation4 + $0xd8] sm:$0xff]  ;;  %v146_v22 = vld [vmem:[#allocation4 + $0xe0] sm:$0xff] }
  0x3b   :  { %590 = vmatprep.subr.bf16.mxu1 %v744_v1  ;;  %v603_v21 = vpack.c.bf16 %v145_v20, %v144_v19  ;;  %v147_v23 = vld [vmem:[#allocation4 + $0xe8] sm:$0xff]  ;;  %v148_v25 = vld [vmem:[#allocation4 + $0xf0] sm:$0xff]  ;;  %v149_v26 = vld [vmem:[#allocation4 + $0xf8] sm:$0xff] }
  0x3c   :  { %v606_v24 = vpack.c.bf16 %v147_v23, %v146_v22  ;;  %v609_v27 = vpack.c.bf16 %v149_v26, %v148_v25  ;;  %v227_v28 = vld [vmem:[#allocation4 + $0x100] sm:$0xff]  ;;  %v228_v29 = vld [vmem:[#allocation4 + $0x108] sm:$0xff]  ;;  %v229_v30 = vld [vmem:[#allocation4 + $0x110] sm:$0xff] }
  0x3d   :  { %v612_v31 = vpack.c.bf16 %v228_v29, %v227_v28  ;;  %v230_v32 = vld [vmem:[#allocation4 + $0x118] sm:$0xff]  ;;  %v231_v34 = vld [vmem:[#allocation4 + $0x120] sm:$0xff]  ;;  %v232_v35 = vld [vmem:[#allocation4 + $0x128] sm:$0xff] }
  0x3e   :  { %592 = vmatpush3.bf16.msra.mxu1 %v591_v9  ;;  %v615_v33 = vpack.c.bf16 %v230_v32, %v229_v30  ;;  %v618_v36 = vpack.c.bf16 %v232_v35, %v231_v34  ;;  %v233_v37 = vld [vmem:[#allocation4 + $0x130] sm:$0xff]  ;;  %v234_v38 = vld [vmem:[#allocation4 + $0x138] sm:$0xff]  ;;  %v235_v40 = vld [vmem:[#allocation4 + $0x140] sm:$0xff] }
  0x3f   :  { %593 = vmatprep.subr.bf16.mxu1 %v744_v1  ;;  %613 = vmatpush3.bf16.msra.mxu0 %v612_v31  ;;  %v621_v39 = vpack.c.bf16 %v234_v38, %v233_v37  ;;  %v236_v41 = vld [vmem:[#allocation4 + $0x148] sm:$0xff]  ;;  %v237_v43 = vld [vmem:[#allocation4 + $0x150] sm:$0xff]  ;;  %v238_v44 = vld [vmem:[#allocation4 + $0x158] sm:$0xff] }
  0x40   :  { %614 = vmatprep.subr.bf16.mxu0 %v744_v1  ;;  %v624_v42 = vpack.c.bf16 %v236_v41, %v235_v40  ;;  %v627_v45 = vpack.c.bf16 %v238_v44, %v237_v43  ;;  %v239_v46 = vld [vmem:[#allocation4 + $0x160] sm:$0xff]  ;;  %v240_v47 = vld [vmem:[#allocation4 + $0x168] sm:$0xff]  ;;  %v241_v54 = vld [vmem:[#allocation4 + $0x170] sm:$0xff] }
  0x41   :  { %v630_v48 = vpack.c.bf16 %v240_v47, %v239_v46  ;;  %v419_v49 = vld [vmem:[#allocation6] ss:$0 sm:$0xff]  ;;  %v242_v55 = vld [vmem:[#allocation4 + $0x178] sm:$0xff]  ;;  %v321_v58 = vld [vmem:[#allocation4 + $0x188] sm:$0xff] }
  0x42   :  { %595 = vmatpush3.bf16.msra.mxu1 %v594_v12  ;;  %v633_v56 = vpack.c.bf16 %v242_v55, %v241_v54  ;;  %v320_v57 = vld [vmem:[#allocation4 + $0x180] sm:$0xff]  ;;  %v322_v59 = vld [vmem:[#allocation4 + $0x190] sm:$0xff]  ;;  %v323_v61 = vld [vmem:[#allocation4 + $0x198] sm:$0xff] }
  0x43   :  { %596 = vmatprep.subr.bf16.mxu1 %v744_v1  ;;  %616 = vmatpush3.bf16.msra.mxu0 %v615_v33  ;;  %v636_v60 = vpack.c.bf16 %v321_v58, %v320_v57  ;;  %v639_v62 = vpack.c.bf16 %v323_v61, %v322_v59  ;;  %v324_v63 = vld [vmem:[#allocation4 + $0x1a0] sm:$0xff]  ;;  %v325_v2 = vld [vmem:[#allocation4 + $0x1a8] sm:$0xff]  ;;  %v327_v4 = vld [vmem:[#allocation4 + $0x1b8] sm:$0xff] }
  0x44   :  { %617 = vmatprep.subr.bf16.mxu0 %v744_v1  ;;  %v642_v3 = vpack.c.bf16 %v325_v2, %v324_v63  ;;  %v328_v6 = vld [vmem:[#allocation4 + $0x1c0] sm:$0xff]  ;;  %v329_v7 = vld [vmem:[#allocation4 + $0x1c8] sm:$0xff]  ;;  %v330_v9 = vld [vmem:[#allocation4 + $0x1d0] sm:$0xff] }
  0x45   :  { %v648_v8 = vpack.c.bf16 %v329_v7, %v328_v6  ;;  %v331_v10 = vld [vmem:[#allocation4 + $0x1d8] sm:$0xff]  ;;  %v332_v12 = vld [vmem:[#allocation4 + $0x1e0] sm:$0xff]  ;;  %v333_v13 = vld [vmem:[#allocation4 + $0x1e8] sm:$0xff] }
  0x46   :  { %598 = vmatpush3.bf16.msra.mxu1 %v597_v15  ;;  %v651_v11 = vpack.c.bf16 %v331_v10, %v330_v9  ;;  %v654_v14 = vpack.c.bf16 %v333_v13, %v332_v12  ;;  %v421_v15 = vld [vmem:[#allocation6 + $0x1] ss:$0 sm:$0xff]  ;;  %v334_v20 = vld [vmem:[#allocation4 + $0x1f0] sm:$0xff]  ;;  %v422_v23 = vld [vmem:[#allocation6 + $0x2] ss:$0 sm:$0xff] }
  0x47   :  { %599 = vmatprep.subr.bf16.mxu1 %v744_v1  ;;  %619 = vmatpush3.bf16.msra.mxu0 %v618_v36  ;;  %v423_v28 = vld [vmem:[#allocation6 + $0x3] ss:$0 sm:$0xff] }
  0x48   :  { %620 = vmatprep.subr.bf16.mxu0 %v744_v1 }
  0x4a   :  { %601 = vmatpush3.bf16.msra.mxu1 %v600_v18 }
  0x4b   :  { %602 = vmatprep.subr.bf16.mxu1 %v744_v1  ;;  %622 = vmatpush3.bf16.msra.mxu0 %v621_v39 }
  0x4c   :  { %623 = vmatprep.subr.bf16.mxu0 %v744_v1 }
  0x4e   :  { %604 = vmatpush3.bf16.msra.mxu1 %v603_v21  ;;  %v335_v21 = vld [vmem:[#allocation4 + $0x1f8] sm:$0xff] }
  0x4f   :  { %605 = vmatprep.subr.bf16.mxu1 %v744_v1  ;;  %625 = vmatpush3.bf16.msra.mxu0 %v624_v42  ;;  %v657_v22 = vpack.c.bf16 %v335_v21, %v334_v20 }
  0x50   :  { %626 = vmatprep.subr.bf16.mxu0 %v744_v1 }
  0x52   :  { %607 = vmatpush3.bf16.msra.mxu1 %v606_v24 }
  0x53   :  { %608 = vmatprep.subr.bf16.mxu1 %v744_v1  ;;  %628 = vmatpush3.bf16.msra.mxu0 %v627_v45 }
  0x54   :  { %629 = vmatprep.subr.bf16.mxu0 %v744_v1 }
  0x56   :  { %610 = vmatpush3.bf16.msra.mxu1 %v609_v27 }
  0x57   :  { %635 = vmatprep.subr.bf16.mxu1 %v744_v1  ;;  %631 = vmatpush3.bf16.msra.mxu0 %v630_v48 }
  0x58   :  { %632 = vmatprep.subr.bf16.mxu0 %v744_v1 }
  0x5b   :  { %634 = vmatpush3.bf16.msra.mxu0 %v633_v56 }
 0x10c   :  { %v128_v50 = vpop.f32.mrb[0].mxu0 }
 0x10d   :  { %v129_v51 = vadd.f32 %v419_v49, %v128_v50  ;;  %v481_v52 = vpop.f32.mrb[1].mxu0 }
 0x10f   :  { %v132_v53 = vmax.f32 %v129_v51, 0.0 }
 0x111   :  { %515 = vmatmul.mubr.f32.vlgmr.msra.gmra.mrb[0].mxu1 %v132_v53 }
 0x112   :  { %584 = vmatprep.mubr.msk.f32.mxu1 %vm743_vm0, %v742_v0  ;;  %637 = vmatpush3.bf16.msra.mxu1 %v636_v60  ;;  %v326_v0 = vld [vmem:[#allocation4 + $0x1b0] sm:$0xff] }
 0x113   :  { %638 = vmatprep.subr.bf16.mxu1 %v744_v1  ;;  %v645_v5 = vpack.c.bf16 %v327_v4, %v326_v0 }
 0x116   :  { %640 = vmatpush3.bf16.msra.mxu1 %v639_v62 }
 0x117   :  { %641 = vmatprep.subr.bf16.mxu1 %v744_v1 }
 0x11a   :  { %643 = vmatpush3.bf16.msra.mxu1 %v642_v3 }
 0x11b   :  { %644 = vmatprep.subr.bf16.mxu1 %v744_v1 }
 0x11e   :  { %646 = vmatpush3.bf16.msra.mxu1 %v645_v5 }
 0x11f   :  { %647 = vmatprep.subr.bf16.mxu1 %v744_v1 }
 0x122   :  { %649 = vmatpush3.bf16.msra.mxu1 %v648_v8 }
 0x123   :  { %650 = vmatprep.subr.bf16.mxu1 %v744_v1 }
 0x126   :  { %652 = vmatpush3.bf16.msra.mxu1 %v651_v11 }
 0x127   :  { %653 = vmatprep.subr.bf16.mxu1 %v744_v1 }
 0x12a   :  { %655 = vmatpush3.bf16.msra.mxu1 %v654_v14 }
 0x12b   :  { %656 = vmatprep.subr.bf16.mxu1 %v744_v1 }
 0x12e   :  { %658 = vmatpush3.bf16.msra.mxu1 %v657_v22 }
 0x1e4   :  { %v221_v16 = vpop.f32.mrb[0].mxu1 }
 0x1e5   :  { %v222_v17 = vadd.f32 %v421_v15, %v221_v16  ;;  %v516_v18 = vpop.f32.mrb[1].mxu1 }
 0x1e7   :  { %v225_v19 = vmax.f32 %v222_v17, 0.0 }
 0x1e9   :  { %550 = vmatmul.mubr.f32.vlgmr.msra.gmra.mrb[2].mxu0 %v225_v19 }
 0x2bc   :  { %v314_v24 = vpop.f32.mrb[2].mxu0 }
 0x2bd   :  { %v315_v25 = vadd.f32 %v422_v23, %v314_v24  ;;  %v551_v26 = vpop.f32.mrb[3].mxu0 }
 0x2bf   :  { %v318_v27 = vmax.f32 %v315_v25, 0.0 }
 0x2c1   :  { %585 = vmatmul.mubr.f32.vlgmr.msra.gmra.mrb[2].mxu1 %v318_v27 }
 0x394   :  { %v407_v29 = vpop.f32.mrb[2].mxu1 }
 0x395   :  { %v408_v1 = vadd.f32 %v423_v28, %v407_v29  ;;  %v586_v30 = vpop.f32.mrb[3].mxu1 }
 0x397   :  { %412 = vst.msk [vmem:[%s840_s3] sm:$0xff] %vm411_vm2, %v408_v1 }
 0x398   :  { %417 = vsyncpa [#allocation3], 1 }
 0x399   :  { %418 = vsyncpa [#allocation5], 1 }

</bundles_post_ra>
